<compile_context>
chip_gen: v7x
topology: tpu7x:2x2x1
jax: 0.10.0
libtpu: 0.0.40
codegen_flags: <defaults>
</compile_context>

<pallas_src>
import jax
import jax.numpy as jnp
from jax import lax
from jax.experimental import pallas as pl
from jax.experimental.pallas import tpu as pltpu


def _qkv_proj_kernel(x_ref, w_ref, qkv_ref):
    """Fused QKV projection for one row tile.

    x_ref: (tm, d_in) bf16; w_ref: (d_in, 3*d_out) bf16 with the softmax scale
    already folded into the query columns; qkv_ref: (tm, 3*d_out) bf16.
    One MXU matmul with N = 3*d_out, f32 accumulation, one lane-dense store.
    """
    qkv_ref[...] = jnp.dot(
        x_ref[...], w_ref[...], preferred_element_type=jnp.float32
    ).astype(qkv_ref.dtype)


def _flash_attn_kernel(q_ref, k_ref, v_ref, o_ref, m_sc, l_sc, acc_sc):
    """Online-softmax causal attention for one (batch, q-tile, kv-tile) step.

    q_ref: (1, tq, d_out) bf16 (pre-scaled), k/v_ref: (1, tk, d_out) bf16,
    o_ref: (1, tq, d_out); scratch m/l: (tq, 1) f32, acc: (tq, d_out) f32.
    Requires tq == tk (asserted in the wrapper) so the diagonal tile always
    has >= 1 unmasked column per row (running max stays finite -> no NaNs).
    """
    tq = q_ref.shape[1]
    tk = k_ref.shape[1]
    qi = pl.program_id(1)
    ki = pl.program_id(2)

    @pl.when(ki == 0)
    def _init():
        m_sc[...] = jnp.full(m_sc.shape, -jnp.inf, jnp.float32)
        l_sc[...] = jnp.zeros(l_sc.shape, jnp.float32)
        acc_sc[...] = jnp.zeros(acc_sc.shape, jnp.float32)

    def _step(diagonal):
        q = q_ref[0]                                           # (tq, d_out) bf16
        k = k_ref[0]                                           # (tk, d_out) bf16
        v = v_ref[0]
        # 'NT' contraction on the last dims: no k-tile transpose before the MXU.
        s = lax.dot_general(
            q, k,
            dimension_numbers=(((1,), (1,)), ((), ())),
            preferred_element_type=jnp.float32)                # (tq, tk) f32
        if diagonal:
            # tq == tk and ki == qi -> tile-local indices suffice for the mask.
            row = lax.broadcasted_iota(jnp.int32, (tq, tk), 0)
            col = lax.broadcasted_iota(jnp.int32, (tq, tk), 1)
            s = jnp.where(col > row, -jnp.inf, s)

        m_prev = m_sc[...]
        m_new = jnp.maximum(m_prev, s.max(axis=-1, keepdims=True))
        alpha = jnp.exp(m_prev - m_new)
        # f32 exp: v5e has no bf16 EUP; only consider bf16 exp on v6e/v7x if a
        # bundle dump shows the EUP slot is binding at your d_out.
        p = jnp.exp(s - m_new)
        l_sc[...] = alpha * l_sc[...] + p.sum(axis=-1, keepdims=True)
        acc_sc[...] = alpha * acc_sc[...] + jnp.dot(
            p.astype(v.dtype), v, preferred_element_type=jnp.float32)
        m_sc[...] = m_new

    # Interior tiles (strictly below the diagonal): no mask VALU work at all.
    @pl.when(ki < qi)
    def _interior():
        _step(diagonal=False)

    # Diagonal tile: tile-local causal mask.
    @pl.when(ki == qi)
    def _diag():
        _step(diagonal=True)

    # kv tiles with ki > qi contribute nothing: compute is skipped and (thanks
    # to the clamped index_map in the wrapper) their K/V blocks are not DMA'd.

    @pl.when(ki == pl.num_programs(2) - 1)
    def _finalize():
        # TODO(synk): dropout on attention weights is identity here (rate=0 /
        # inference); a training-mode dropout would use pltpu.prng_*.
        inv_l = pl.reciprocal(l_sc[...], approx=True)          # EUP slot, ~free
        o_ref[0] = (acc_sc[...] * inv_l).astype(o_ref.dtype)


def causal_self_attention(x, wq, wk, wv):
    """x: (B, T, d_in); wq/wk/wv: (d_in, d_out). Returns (B, T, d_out)."""
    B, T, d_in = x.shape
    d_out = wq.shape[1]
    scale = 1.0 / float(d_out) ** 0.5

    # ---- fused QKV projection ----------------------------------------------
    # Fold batch into M rows; fold the softmax scale into the query weight so
    # the kernel is a single matmul + one lane-dense store.  MXU operands are
    # bf16 with f32 accumulation inside the kernel.
    w_qkv = jnp.concatenate([wq * scale, wk, wv], axis=1).astype(jnp.bfloat16)
    x2d = x.reshape(B * T, d_in).astype(jnp.bfloat16)

    M = B * T
    tm = M if M <= 512 else 512
    assert M % tm == 0, "row count must tile evenly for this simple wrapper"

    qkv2d = pl.pallas_call(
        _qkv_proj_kernel,
        out_shape=jax.ShapeDtypeStruct((M, 3 * d_out), jnp.bfloat16),
        grid_spec=pltpu.PrefetchScalarGridSpec(
            num_scalar_prefetch=0,
            grid=(M // tm,),
            in_specs=[
                pl.BlockSpec((tm, d_in), lambda i: (i, 0)),
                # Constant weight block: single-buffered (its index never
                # changes, so double-buffering only wastes VMEM).  For real
                # model widths where d_in*3*d_out*2B nears the scoped-VMEM
                # limit, add a K grid axis + f32 accumulator instead of
                # keeping the whole weight resident.
                pl.BlockSpec((d_in, 3 * d_out), lambda i: (0, 0),
                             pipeline_mode=pl.Buffered(1)),
            ],
            out_specs=pl.BlockSpec((tm, 3 * d_out), lambda i: (i, 0)),
        ),
        compiler_params=pltpu.CompilerParams(
            dimension_semantics=("parallel",)),
    )(x2d, w_qkv)

    q = qkv2d[:, :d_out].reshape(B, T, d_out)
    k = qkv2d[:, d_out:2 * d_out].reshape(B, T, d_out)
    v = qkv2d[:, 2 * d_out:].reshape(B, T, d_out)

    # ---- flash-style causal attention ---------------------------------------
    # 256-wide tiles fill the v6e/v7x 256x256 MXU and halve per-step grid
    # overhead; v5e's MXU is 128-wide and HBM-bound, so stay at 128 there.
    kind = jax.devices()[0].device_kind.lower()
    base_tile = 128 if "v5" in kind else 256
    tq = tk = min(T, base_tile)
    assert tq == tk, "online-softmax NaN-free guarantee requires tq == tk"
    assert T % tq == 0, "T must be a multiple of the tile size"
    nq = T // tq
    nkv = T // tk

    out = pl.pallas_call(
        _flash_attn_kernel,
        out_shape=jax.ShapeDtypeStruct((B, T, d_out), x.dtype),
        grid_spec=pltpu.PrefetchScalarGridSpec(
            num_scalar_prefetch=0,
            grid=(B, nq, nkv),
            in_specs=[
                pl.BlockSpec((1, tq, d_out), lambda b, qi, ki: (b, qi, 0)),
                # Clamp the kv block index: above-diagonal (ki > qi) steps are
                # causally skipped, so re-use the resident block -> Pallas
                # issues no new DMA for them (~2x K/V HBM traffic cut).
                # (On v5e, additionally sweep pipeline_mode=pl.Buffered(3).)
                pl.BlockSpec((1, tk, d_out),
                             lambda b, qi, ki: (b, jnp.minimum(ki, qi), 0)),
                pl.BlockSpec((1, tk, d_out),
                             lambda b, qi, ki: (b, jnp.minimum(ki, qi), 0)),
            ],
            out_specs=pl.BlockSpec((1, tq, d_out),
                                   lambda b, qi, ki: (b, qi, 0)),
            scratch_shapes=[
                pltpu.VMEM((tq, 1), jnp.float32),       # running max
                pltpu.VMEM((tq, 1), jnp.float32),       # running sum
                pltpu.VMEM((tq, d_out), jnp.float32),   # output accumulator
            ],
        ),
        # batch/q-tile axes parallel (megacore sharding on v7x), kv reduction
        # axis innermost + arbitrary (carries the VMEM accumulators).
        compiler_params=pltpu.CompilerParams(
            dimension_semantics=("parallel", "parallel", "arbitrary")),
    )(q, k, v)

    # TODO(synk): for very long T, replace the rectangular (nq, nkv) grid with
    # a lower-triangular work list via scalar prefetch to also remove the
    # ~0.35 us grid overhead of the skipped above-diagonal steps.
    return out


def _reference(x, wq, wk, wv):
    # Pure-JAX f32 reference mirroring the PyTorch forward.
    q = x @ wq
    k = x @ wk
    v = x @ wv
    s = jnp.einsum("btd,bsd->bts", q, k)
    T = x.shape[1]
    mask = jnp.triu(jnp.ones((T, T), dtype=bool), k=1)
    s = jnp.where(mask[None], -jnp.inf, s)
    w = jax.nn.softmax(s / (wq.shape[1] ** 0.5), axis=-1)
    return jnp.einsum("bts,bsd->btd", w, v)


def _run_case(key, B, T, d_in, d_out):
    kx, kq, kk, kv = jax.random.split(key, 4)
    x = jax.random.normal(kx, (B, T, d_in), dtype=jnp.float32)

    # Deterministic Linear-style init: U(-1/sqrt(d_in), 1/sqrt(d_in)),
    # stored as (d_in, d_out) so the kernel computes x @ W.
    bound = 1.0 / (d_in ** 0.5)
    wq = jax.random.uniform(kq, (d_in, d_out), jnp.float32, -bound, bound)
    wk = jax.random.uniform(kk, (d_in, d_out), jnp.float32, -bound, bound)
    wv = jax.random.uniform(kv, (d_in, d_out), jnp.float32, -bound, bound)

    out = jax.block_until_ready(causal_self_attention(x, wq, wk, wv))
    ref = _reference(x, wq, wk, wv)
    assert out.shape == (B, T, d_out)
    # bf16 MXU operands + approx reciprocal -> loosened tolerance vs f32 ref.
    err = jnp.max(jnp.abs(out - ref))
    assert err < 5e-2, f"B={B} T={T}: max abs error {err}"
    return float(err)


if __name__ == "__main__":
    key = jax.random.PRNGKey(0)
    k1, k2 = jax.random.split(key)

    # Small shapes consistent with the module: batch=2, seq(=context_length)=8,
    # d_in=d_out=32, dropout=0.0 (identity), qkv_bias=False -> single-tile path.
    _run_case(k1, B=2, T=8, d_in=32, d_out=32)

    # Longer context (T >= 2*tile) exercising the multi-tile online-softmax
    # path, the causal tile skip, and the clamped K/V index_map.
    _run_case(k2, B=2, T=512, d_in=32, d_out=32)

    print("KERNEL_OK")
</pallas_src>

<mosaic_0001>
module attributes {stable_mosaic.version = 11 : i64} {
  func.func @_qkv_proj_kernel(%arg0: i32, %arg1: memref<16x32xbf16, #tpu.memory_space<vmem>>, %arg2: memref<32x96xbf16, #tpu.memory_space<vmem>>, %arg3: memref<16x96xbf16, #tpu.memory_space<vmem>>) attributes {dimension_semantics = [#tpu.dimension_semantics<parallel>], iteration_bounds = array<i64: 1>, scalar_prefetch = 0 : i64, scratch_operands = 0 : i64, tpu.core_type = #tpu.core_type<tc>, window_params = [{transform_indices = @transform_0, window_bounds = array<i64: 16, 32>}, {pipeline_mode = #tpu.pipeline_mode<synchronous>, transform_indices = @transform_1, window_bounds = array<i64: 32, 96>}, {transform_indices = @transform_2, window_bounds = array<i64: 16, 96>}]} {
    %c0 = arith.constant 0 : index
    %c0_0 = arith.constant 0 : index
    %0 = vector.load %arg1[%c0, %c0_0] : memref<16x32xbf16, #tpu.memory_space<vmem>>, vector<16x32xbf16>
    %c0_1 = arith.constant 0 : index
    %c0_2 = arith.constant 0 : index
    %1 = vector.load %arg2[%c0_1, %c0_2] : memref<32x96xbf16, #tpu.memory_space<vmem>>, vector<32x96xbf16>
    %cst = arith.constant dense<0.000000e+00> : vector<16x96xf32>
    %2 = tpu.matmul %0, %1, %cst {dimension_numbers = #tpu.dot_dimension_numbers<[1], [0], [0], [1], [0, 0, 1, 1], [], []>} : vector<16x32xbf16>, vector<32x96xbf16>, vector<16x96xf32> -> vector<16x96xf32>
    %3 = arith.truncf %2 : vector<16x96xf32> to vector<16x96xbf16>
    %c0_3 = arith.constant 0 : index
    %c0_4 = arith.constant 0 : index
    %4 = vector.load %arg3[%c0_3, %c0_4] : memref<16x96xbf16, #tpu.memory_space<vmem>>, vector<16x96xbf16>
    tpu.vector_store %arg3[%c0_3, %c0_4], %3 {strides = array<i32>} : memref<16x96xbf16, #tpu.memory_space<vmem>>, vector<16x96xbf16>,
    return
  }
  func.func @transform_0(%arg0: i32) -> (i32, i32) {
    %c0_i32 = arith.constant 0 : i32
    %c0_i32_0 = arith.constant 0 : i32
    return %arg0, %c0_i32 : i32, i32
  }
  func.func @transform_1(%arg0: i32) -> (i32, i32) {
    %c0_i32 = arith.constant 0 : i32
    %c0_i32_0 = arith.constant 0 : i32
    %c0_i32_1 = arith.constant 0 : i32
    return %c0_i32, %c0_i32_0 : i32, i32
  }
  func.func @transform_2(%arg0: i32) -> (i32, i32) {
    %c0_i32 = arith.constant 0 : i32
    %c0_i32_0 = arith.constant 0 : i32
    return %arg0, %c0_i32 : i32, i32
  }
}

</mosaic_0001>

<bundles_post_ra>
// kernel: tpu_custom_call.1
= control target key start
LH: loop header
LB: loop body
LE: loop exit
PB: predicated region body
PF: predicated region fallthrough
CT: control target
= control target key end

     0   :  { %7 = vsyncpa [#allocation3], 0  ;;  %s306_s0 = inlined_call_operand.hbm [shape: bf16[16,32], index: 0, kind: input, shape index: {}]   ;;  %s307_s1 = inlined_call_operand.hbm [shape: bf16[32,96], index: 1, kind: input, shape index: {}]   ;;  %s308_s2 = inlined_call_operand.hbm [shape: bf16[16,96], index: 2, kind: output, shape index: {}]  }
   0x1   :  { %8 = vsyncpa [#allocation6], 0 }
   0x2   :  { %9 = vsyncpa [#allocation4], 0  ;;  %s239_s9 = smov [#allocation2]   ;;  %s167_s13 = scalar_lea.hbm %s306_s0, 128 }
   0x3   :  { %s15_s10 = sshll.u32 %s239_s9, 4  ;;  %p168_p0 = scmp.ne.s32.totalorder %s306_s0, %s167_s13  ;;  %s16_s10 = int_to_ptr.vmem [resolvable:$true] %s15_s10 }
   0x4   :  { %p171_p1 = scmp.lt.u32.totalorder %s167_s13, %s306_s0 }
   0x6   :  { %p173_p2 = pnand %p171_p1, %p168_p0 }
   0x8   :  { %176 = shalt.err (!%p173_p2)
}
   0x9   :  { %s177_s18 = scalar_lea.vmem %s16_s10, 128  ;;  %p182_p4 = scmp.lt.s32.totalorder %s16_s10, %s16_s10 }
   0xa   :  { %p178_p3 = scmp.ne.s32.totalorder %s16_s10, %s177_s18  ;;  %p183_p5 = scmp.lt.s32.totalorder %s177_s18, %s177_s18 }
   0xc   :  { %p184_p6 = por %p183_p5, %p182_p4 }
   0xe   :  { %p185_p7 = pnand %p184_p6, %p178_p3 }
  0x10   :  { %188 = shalt.err (!%p185_p7)
}
  0x11   :  { %s240_s19 = smov 64   ;;  %s241_s20 = smov 4  }
  0x12   :  { %21 = dma.hbm_to_vmem [thread:$0]  %s306_s0, 128, %s16_s10, [#allocation3], %s240_s19, %s240_s19, %s241_s20  }
  0x13   :  { %s242_s23 = smov [#allocation5]   ;;  %s189_s27 = scalar_lea.hbm %s307_s1, 256 }
  0x14   :  { %s27_s24 = sshll.u32 %s242_s23, 4  ;;  %p190_p8 = scmp.ne.s32.totalorder %s307_s1, %s189_s27  ;;  %s28_s24 = int_to_ptr.vmem [resolvable:$true] %s27_s24 }
  0x15   :  { %p193_p9 = scmp.lt.u32.totalorder %s189_s27, %s307_s1 }
  0x17   :  { %p195_p10 = pnand %p193_p9, %p190_p8 }
  0x19   :  { %198 = shalt.err (!%p195_p10)
}
  0x1a   :  { %s199_s4 = scalar_lea.vmem %s28_s24, 256  ;;  %p204_p12 = scmp.lt.s32.totalorder %s28_s24, %s28_s24 }
  0x1b   :  { %p200_p11 = scmp.ne.s32.totalorder %s28_s24, %s199_s4  ;;  %p205_p13 = scmp.lt.s32.totalorder %s199_s4, %s199_s4 }
  0x1d   :  { %p206_p0 = por %p205_p13, %p204_p12 }
  0x1f   :  { %p207_p1 = pnand %p206_p0, %p200_p11 }
  0x21   :  { %210 = shalt.err (!%p207_p1)
}
  0x22   :  { %33 = dma.hbm_to_vmem [thread:$0]  %s307_s1, 256, %s28_s24, [#allocation6], %s240_s19, %s240_s19, %s241_s20  }
  0x23   :  { %233 = dma.done.wait [#allocation3], 128  }
  0x24   :  { %234 = vsyncadd [#allocation3], 4294967168 }
  0x25   :  { %235 = dma.done.wait [#allocation6], 256  }
  0x26   :  { %236 = vsyncadd [#allocation6], 4294967040  ;;  %v243_v0 = vmov 0.0   ;;  %vm244_vm0 = vmmov 0   ;;  %v164_v1 = vld [vmem:[#allocation5] sm:$0xff]   ;;  %v165_v2 = vld [vmem:[#allocation5 + $0x8] sm:$0xff]  }
  0x27   :  { %149 = vmatprep.subr.bf16.mxu0 %v243_v0  ;;  %153 = vmatprep.mubr.msk.bf16.mxu0 %vm244_vm0, %v243_v0  ;;  %v166_v3 = vld [vmem:[#allocation2] sm:$0xff]   ;;  %vm64_vm1 = vcmask 261120   ;;  %vm117_vm2 = vcmask 781312   ;;  %s245_s6 = smov [#allocation7]  }
  0x28   :  { %150 = vmatpush3.bf16.msra.mxu0 %v164_v1  ;;  %s125_s1 = sshll.u32 %s245_s6, 4  ;;  %s126_s1 = int_to_ptr.vmem [resolvable:$true] %s125_s1 }
  0x29   :  { %151 = vmatprep.subr.bf16.mxu0 %v243_v0  ;;  %s211_s7 = scalar_lea.vmem %s126_s1, 128  ;;  %p216_p3 = scmp.lt.s32.totalorder %s126_s1, %s126_s1 }
  0x2a   :  { %p212_p2 = scmp.ne.s32.totalorder %s126_s1, %s211_s7  ;;  %p217_p4 = scmp.lt.s32.totalorder %s211_s7, %s211_s7 }
  0x2c   :  { %152 = vmatpush3.bf16.msra.mxu0 %v165_v2  ;;  %p218_p5 = por %p217_p4, %p216_p3 }
  0x2e   :  { %p219_p6 = pnand %p218_p5, %p212_p2 }
  0x2f   :  { %154 = vmatmul.mubr.msk.bf16.vlgmr.msra.gmra.mrb[0].mxu0 %vm64_vm1, %v166_v3 }
 0x102   :  { %v102_v4 = vpop.f32.mrb[0].mxu0 }
 0x103   :  { %v144_v5 = vpack.c.bf16 %v102_v4, %v102_v4  ;;  %v155_v6 = vpop.f32.mrb[1].mxu0 }
 0x104   :  { %v105_v7 = vpop.f32.mrb[2].mxu0 }
 0x105   :  { %v145_v8 = vpack.c.bf16 %v105_v7, %v105_v7  ;;  %v156_v9 = vpop.f32.mrb[3].mxu0  ;;  %118 = vst.msk [vmem:[#allocation7] sm:$0xf] %vm117_vm2, %v144_v5 }
 0x107   :  { %119 = vst.msk [vmem:[#allocation7 + $0x4] sm:$0xf] %vm117_vm2, %v145_v8 }
 0x108   :  { %222 = shalt.err (!%p219_p6)
}
 0x109   :  { %s223_s10 = scalar_lea.hbm %s308_s2, 128 }
 0x10a   :  { %p224_p7 = scmp.ne.s32.totalorder %s308_s2, %s223_s10  ;;  %p227_p8 = scmp.lt.u32.totalorder %s223_s10, %s308_s2 }
 0x10c   :  { %p229_p9 = pnand %p227_p8, %p224_p7 }
 0x10e   :  { %232 = shalt.err (!%p229_p9)
}
 0x10f   :  { %131 = dma.vmem_to_hbm [thread:$0]  %s126_s1, 128, %s308_s2, [#allocation4], %s240_s19, %s240_s19, %s241_s20  }
 0x110   :  { %237 = dma.done.wait [#allocation4], 128  }
 0x111   :  { %238 = vsyncadd [#allocation4], 4294967168 }
 0x112   :  { %135 = vsyncpa [#allocation3], 1 }
 0x113   :  { %136 = vsyncpa [#allocation6], 1 }
 0x114   :  { %137 = vsyncpa [#allocation4], 1 }

</bundles_post_ra>
